<compile_context>
chip_gen: v5e
topology: v5e:2x2
jax: 0.10.0
libtpu: 0.0.40
codegen_flags: <defaults>
</compile_context>

<pallas_src>
import functools

import jax
import jax.numpy as jnp
from jax import lax
from jax.experimental import pallas as pl
from jax.experimental.pallas import tpu as pltpu


# ---------------------------------------------------------------------------
# VMEM budgeting (generation-aware).
# ---------------------------------------------------------------------------
def _vmem_limits():
    """Return (tiling_budget_bytes, vmem_limit_bytes) derived from the chip's VMEM.

    ~35% of capacity is used to size resident tiles, ~60% is handed to Mosaic as the
    scoped limit (v7x: 64 MiB/TC -> ~22/38 MiB; v5e/v6e: 128 MiB -> ~45/77 MiB).
    """
    cap = 64 * 1024 * 1024            # conservative default = v7x per-TensorCore VMEM
    try:
        cap = int(pltpu.get_tpu_info().vmem_capacity_bytes)
    except Exception:                 # no TPU client / older jax: keep the safe default
        pass
    budget = int(cap * 0.35)
    limit = min(int(cap * 0.60), 100 * 1024 * 1024)
    return budget, limit


# ---------------------------------------------------------------------------
# Primary kernel: lane-dense packed layout (W*C on the 128-wide lane axis).
# ---------------------------------------------------------------------------
def _sepconv_packed_kernel(x_ref, dwl_ref, pwk_ref, o_ref, *, KH, KW, Cin, TH):
    """One (batch, row-block) step of the fused conv in packed layout.

    x_ref  : (1, Hp, Wp*Cin)          full padded rows of this image (VMEM-resident)
    dwl_ref: (KH*KW, W_out*Cin)       depthwise weights tiled across lanes (f32)
    pwk_ref: (W_out*Cin, W_out*Cout)  block-diagonal pointwise weights kron(I, PW)
    o_ref  : (1, TH, W_out*Cout)      lane-dense output row block
    """
    WoC_in = dwl_ref.shape[1]
    r = pl.program_id(1)
    row0 = r * TH
    if TH % 8 == 0:                       # hint sublane alignment of the row offset
        row0 = pl.multiple_of(row0, 8)

    dwl = dwl_ref[...]                    # (KH*KW, WoC_in), already f32 (hoisted)

    # Depthwise conv: KH dynamic row loads, KW static lane-shifted slices, VPU FMAs.
    acc = None
    for kh in range(KH):
        rows = x_ref[0, pl.ds(row0 + kh, TH), :].astype(jnp.float32)   # (TH, Wp*Cin)
        for kw in range(KW):
            patch = rows[:, kw * Cin: kw * Cin + WoC_in]               # (TH, WoC_in)
            contrib = patch * dwl[kh * KW + kw]
            acc = contrib if acc is None else acc + contrib            # init from 1st tap

    # Pointwise 1x1 as a block-diagonal matmul: stays lane-packed, runs on the MXU.
    y = jnp.dot(acc.astype(pwk_ref.dtype), pwk_ref[...],
                preferred_element_type=jnp.float32)                    # (TH, WoC_out)
    o_ref[0] = y.astype(o_ref.dtype)


def _pick_packed_row_block(N, H_out):
    """Largest multiple-of-8 divisor of H_out (sublane-aligned output stores), reduced
    until the grid has >= 4 steps so both v7x TensorCores get work and output-store DMA
    overlaps compute."""
    cands = [t for t in range(8, H_out + 1, 8) if H_out % t == 0]
    if not cands:
        return H_out                      # no aligned divisor: single full-height block
    th = max(cands)
    while N * (H_out // th) < 4:
        smaller = [t for t in cands if t < th]
        if not smaller:
            break
        th = max(smaller)
    return th


# ---------------------------------------------------------------------------
# Fallback kernel: (.., W, C) layout with pl.Element row halos (large channels).
# ---------------------------------------------------------------------------
def _sepconv_unpacked_kernel(x_ref, dw_ref, pw_ref, o_ref, *, use_mxu):
    """x_ref: (1, TH+KH-1, Wp, Cin); dw_ref: (KH,KW,Cin) f32; pw_ref: (Cin,Cout);
    o_ref: (1, TH, W_out, Cout)."""
    _, TH, W_out, Cout = o_ref.shape
    KH, KW, Cin = dw_ref.shape

    dw = dw_ref[...]                                                   # f32 (wrapper cast)

    acc = None
    for kh in range(KH):
        for kw in range(KW):
            patch = x_ref[0, kh:kh + TH, kw:kw + W_out, :]             # (TH, W_out, Cin)
            contrib = patch * dw[kh, kw]                               # promotes to f32
            acc = contrib if acc is None else acc + contrib

    if use_mxu:
        # MXU path; operands are bf16 when the input is bf16 (wrapper picks pw dtype).
        y2 = jnp.dot(acc.reshape(TH * W_out, Cin).astype(pw_ref.dtype), pw_ref[...],
                     preferred_element_type=jnp.float32)
        y = y2.reshape(TH, W_out, Cout)
    else:
        # Tiny Cin/Cout: VPU broadcast-FMA over Cin, no reshape/relayout.
        pw = pw_ref[...]                                               # f32
        y = None
        for ci in range(Cin):
            contrib = acc[:, :, ci:ci + 1] * pw[ci]                    # (TH, W_out, Cout)
            y = contrib if y is None else y + contrib

    o_ref[0] = y.astype(o_ref.dtype)


def _pick_row_block(N, H_out, Wp, W_out, Cin, Cout, KH, itemsize, budget):
    """Largest row-block TH dividing H_out whose layout-padded, double-buffered VMEM
    footprint (with a 1.5x margin for tap/reshape temporaries) fits the budget, then
    reduced if needed so the grid has >= 2 steps."""
    lane = lambda c: -(-c // 128) * 128
    sub = lambda w: -(-w // 8) * 8

    def footprint(th):
        inp = 2 * (th + KH - 1) * sub(Wp) * lane(Cin) * itemsize       # 2 pipeline buffers
        out = 2 * th * sub(W_out) * lane(Cout) * itemsize
        tmp = th * sub(W_out) * (2 * lane(Cin) + lane(Cout)) * 4       # acc + tap copy + y
        return int(1.5 * (inp + out + tmp))                            # Mosaic margin

    best = 1
    for th in range(1, H_out + 1):
        if H_out % th == 0 and footprint(th) <= budget:
            best = th
    if N * (H_out // best) < 2:                  # keep both v7x TensorCores busy
        for th in range(best - 1, 0, -1):
            if H_out % th == 0 and H_out // th >= 2:
                best = th
                break
    return best


# ---------------------------------------------------------------------------
# Wrappers.
# ---------------------------------------------------------------------------
@functools.partial(jax.jit,
                   static_argnames=("padding", "row_block", "use_mxu", "force_unpacked"))
def separable_conv2d_nhwc(x_nhwc, dw_hwc, pw_io, *, padding=0, row_block=None,
                          use_mxu=None, force_unpacked=False):
    """Fused depthwise(KHxKW, per-channel) + pointwise(1x1) conv; stride=1, dilation=1.

    x_nhwc: (N, H, W, Cin);  dw_hwc: (KH, KW, Cin);  pw_io: (Cin, Cout).
    Returns (N, H_out, W_out, Cout) in NHWC (no layout transposes on this entry point).
    """
    N, H, W, Cin = x_nhwc.shape
    KH, KW, Cin_dw = dw_hwc.shape
    Cin_pw, Cout = pw_io.shape
    assert Cin_dw == Cin and Cin_pw == Cin
    H_out = H + 2 * padding - (KH - 1)
    W_out = W + 2 * padding - (KW - 1)
    assert H_out > 0 and W_out > 0

    budget, vmem_limit = _vmem_limits()
    itemsize = x_nhwc.dtype.itemsize

    Hp, Wp = H + 2 * padding, W + 2 * padding
    WpC = Wp * Cin
    WoC_in, WoC_out = W_out * Cin, W_out * Cout

    lane = lambda c: -(-c // 128) * 128
    sub = lambda r: -(-r // 8) * 8
    packed_resident = (2 * sub(Hp) * lane(WpC) * itemsize              # resident input x2
                       + sub(WoC_in) * lane(WoC_out) * 4               # kron weights
                       + 2 * 8 * lane(WoC_out) * itemsize              # output blocks
                       + 4 * sub(Hp) * lane(WpC) * 4)                  # f32 temporaries
    packed_ok = (not force_unpacked
                 and Cin <= 32
                 and WoC_in * WoC_out * 4 <= (2 << 20)                 # kron <= 2 MiB
                 and packed_resident <= budget)

    if packed_ok:
        # ------------------------- lane-dense packed path -------------------------
        TH = _pick_packed_row_block(N, H_out) if row_block is None else int(row_block)
        assert H_out % TH == 0 and (TH % 8 == 0 or TH == H_out), (H_out, TH)
        R = H_out // TH

        # Single fused HBM pass: pack channels onto the lane axis and zero-pad H / W*Cin.
        # TODO(synk): fold this padding into the kernel (clamped row offsets + lane masks).
        x_packed = jnp.pad(x_nhwc.reshape(N, H, W * Cin),
                           ((0, 0), (padding, padding), (padding * Cin, padding * Cin)))

        # Depthwise weights tiled across lanes: dwl[t, w*Cin + ci] = dw[kh, kw, ci].
        dwl = jnp.tile(dw_hwc.reshape(KH * KW, Cin), (1, W_out)).astype(jnp.float32)
        # Block-diagonal pointwise weights: kron(I_Wout, PW) keeps the matmul lane-packed.
        mxu_dtype = jnp.bfloat16 if x_nhwc.dtype == jnp.bfloat16 else jnp.float32
        pwk = jnp.kron(jnp.eye(W_out, dtype=jnp.float32),
                       pw_io.astype(jnp.float32)).astype(mxu_dtype)

        kernel = functools.partial(_sepconv_packed_kernel, KH=KH, KW=KW, Cin=Cin, TH=TH)
        out_packed = pl.pallas_call(
            kernel,
            out_shape=jax.ShapeDtypeStruct((N, H_out, WoC_out), x_nhwc.dtype),
            grid_spec=pltpu.PrefetchScalarGridSpec(
                num_scalar_prefetch=0,
                grid=(N, R),                                   # batch x output row-blocks
                in_specs=[
                    # Full padded image rows per batch element; the block index ignores r
                    # so Pallas keeps it VMEM-resident across the row-blocks of an image.
                    pl.BlockSpec((1, Hp, WpC), lambda n, r: (n, 0, 0)),
                    pl.BlockSpec((KH * KW, WoC_in), lambda n, r: (0, 0)),
                    pl.BlockSpec((WoC_in, WoC_out), lambda n, r: (0, 0)),
                ],
                out_specs=pl.BlockSpec((1, TH, WoC_out), lambda n, r: (n, r, 0)),
            ),
            compiler_params=pltpu.CompilerParams(
                dimension_semantics=("parallel", "parallel"),  # shards over v7x's 2 TCs
                vmem_limit_bytes=vmem_limit,
            ),
        )(x_packed, dwl, pwk)
        return out_packed.reshape(N, H_out, W_out, Cout)

    # ------------- fallback: (.., W, C) layout with pl.Element row halos -------------
    # TODO(synk): add a W-tiled packed variant for wide images with small channels
    # (currently they take this path because kron(I_Wout, PW) would exceed 2 MiB).
    x_pad = jnp.pad(x_nhwc, ((0, 0), (padding, padding), (padding, padding), (0, 0)))
    Wp_ = x_pad.shape[2]

    if row_block is None:
        TH = _pick_row_block(N, H_out, Wp_, W_out, Cin, Cout, KH, itemsize, budget)
    else:
        TH = int(row_block)
    # TODO(synk): ragged last row-block (H_out % TH != 0) not supported yet.
    assert H_out % TH == 0, (H_out, TH)
    R = H_out // TH
    halo_rows = TH + KH - 1

    if use_mxu is None:
        # TODO(synk): make this crossover generation-aware (MXU tile is 128 on v5e vs 256
        # on v6e/v7x; v5e has no bf16 VPU so it should route to the MXU earlier).
        use_mxu = (Cin > 32) or (Cin * Cout > 1024)
    use_mxu = bool(use_mxu)

    dw_f32 = dw_hwc.astype(jnp.float32)                        # cast once in the wrapper
    if use_mxu and x_nhwc.dtype == jnp.bfloat16:
        pw_kernel = pw_io.astype(jnp.bfloat16)                 # bf16-native MXU operands
    else:
        pw_kernel = pw_io.astype(jnp.float32)

    kernel = functools.partial(_sepconv_unpacked_kernel, use_mxu=use_mxu)
    return pl.pallas_call(
        kernel,
        out_shape=jax.ShapeDtypeStruct((N, H_out, W_out, Cout), x_nhwc.dtype),
        grid_spec=pltpu.PrefetchScalarGridSpec(
            num_scalar_prefetch=0,
            grid=(N, R),
            in_specs=[
                # Overlapping row-blocks: element-offset indexing on H gives each block a
                # (KH-1)-row halo while keeping automatic double-buffered pipelining.
                pl.BlockSpec((1, pl.Element(halo_rows), Wp_, Cin),
                             lambda n, r: (n, r * TH, 0, 0)),
                pl.BlockSpec((KH, KW, Cin), lambda n, r: (0, 0, 0)),
                pl.BlockSpec((Cin, Cout), lambda n, r: (0, 0)),
            ],
            out_specs=pl.BlockSpec((1, TH, W_out, Cout), lambda n, r: (n, r, 0, 0)),
        ),
        compiler_params=pltpu.CompilerParams(
            dimension_semantics=("parallel", "parallel"),
            vmem_limit_bytes=vmem_limit,
        ),
    )(x_pad, dw_f32, pw_kernel)


@functools.partial(jax.jit,
                   static_argnames=("stride", "padding", "dilation", "row_block",
                                    "use_mxu", "force_unpacked"))
def separable_conv2d(x_nchw, dw_weight, pw_weight, *, stride=1, padding=0, dilation=1,
                     row_block=None, use_mxu=None, force_unpacked=False):
    """PyTorch-layout entry point matching SeparableConv2d.forward (bias=False).

    x_nchw: (N, Cin, H, W);  dw_weight (conv1.weight): (Cin, 1, KH, KW);
    pw_weight (pointwise.weight): (Cout, Cin, 1, 1).  Returns NCHW output.
    """
    if stride != 1 or dilation != 1:
        raise NotImplementedError(
            "Pallas SeparableConv2d kernel supports stride=1, dilation=1 "
            "(the module defaults).")
    # TODO(synk): bias=True variant of the module is not implemented (default is False).
    x_nhwc = jnp.transpose(x_nchw, (0, 2, 3, 1))                 # (N, H, W, Cin)
    dw_hwc = jnp.transpose(dw_weight[:, 0, :, :], (1, 2, 0))     # (KH, KW, Cin)
    pw_io = jnp.transpose(pw_weight[:, :, 0, 0], (1, 0))         # (Cin, Cout)
    out_nhwc = separable_conv2d_nhwc(x_nhwc, dw_hwc, pw_io, padding=padding,
                                     row_block=row_block, use_mxu=use_mxu,
                                     force_unpacked=force_unpacked)
    return jnp.transpose(out_nhwc, (0, 3, 1, 2))                 # back to NCHW


def _reference(x_nchw, dw_weight, pw_weight, padding):
    """Pure-JAX reference mirroring the PyTorch module (NCHW, OIHW weights)."""
    Cin = x_nchw.shape[1]
    y = lax.conv_general_dilated(
        x_nchw, dw_weight, window_strides=(1, 1),
        padding=((padding, padding), (padding, padding)),
        dimension_numbers=("NCHW", "OIHW", "NCHW"),
        feature_group_count=Cin)
    y = lax.conv_general_dilated(
        y, pw_weight, window_strides=(1, 1), padding="VALID",
        dimension_numbers=("NCHW", "OIHW", "NCHW"))
    return y


if __name__ == "__main__":
    # SeparableConv2d(4, 8, kernel_size=3, padding=1) at small, PyTorch-consistent shapes.
    N, Cin, Cout, H, W = 2, 4, 8, 16, 16
    KH = KW = 3
    padding = 1

    key = jax.random.PRNGKey(0)
    kx, kd, kp = jax.random.split(key, 3)
    x = jax.random.normal(kx, (N, Cin, H, W), dtype=jnp.float32)
    dw_weight = jax.random.normal(kd, (Cin, 1, KH, KW), dtype=jnp.float32) * 0.1
    pw_weight = jax.random.normal(kp, (Cout, Cin, 1, 1), dtype=jnp.float32) * 0.1

    ref = _reference(x, dw_weight, pw_weight, padding)

    # 1) Primary lane-dense packed path (auto row-block: 2 row-blocks x 2 images = 4 steps).
    out = separable_conv2d(x, dw_weight, pw_weight, padding=padding)
    out = jax.block_until_ready(out)
    assert out.shape == (N, Cout, H, W), out.shape
    assert jnp.allclose(out, ref, atol=1e-4, rtol=1e-4), float(jnp.abs(out - ref).max())

    # 2) Fallback (.., W, C) kernel, VPU pointwise branch.
    out_fb = separable_conv2d(x, dw_weight, pw_weight, padding=padding,
                              force_unpacked=True)
    out_fb = jax.block_until_ready(out_fb)
    assert jnp.allclose(out_fb, ref, atol=1e-4, rtol=1e-4), \
        float(jnp.abs(out_fb - ref).max())

    # 3) Fallback kernel, MXU pointwise branch.
    out_mxu = separable_conv2d(x, dw_weight, pw_weight, padding=padding,
                               force_unpacked=True, use_mxu=True)
    out_mxu = jax.block_until_ready(out_mxu)
    assert jnp.allclose(out_mxu, ref, atol=1e-4, rtol=1e-4), \
        float(jnp.abs(out_mxu - ref).max())

    print("KERNEL_OK")
</pallas_src>

<mosaic_0001>
module attributes {stable_mosaic.version = 11 : i64} {
  func.func @_sepconv_packed_kernel(%arg0: i32, %arg1: i32, %arg2: memref<1x18x72xf32, #tpu.memory_space<vmem>>, %arg3: memref<9x64xf32, #tpu.memory_space<vmem>>, %arg4: memref<64x128xf32, #tpu.memory_space<vmem>>, %arg5: memref<1x8x128xf32, #tpu.memory_space<vmem>>) attributes {dimension_semantics = [#tpu.dimension_semantics<parallel>, #tpu.dimension_semantics<parallel>], iteration_bounds = array<i64: 2, 2>, scalar_prefetch = 0 : i64, scratch_operands = 0 : i64, tpu.core_type = #tpu.core_type<tc>, window_params = [{transform_indices = @transform_0, window_bounds = array<i64: 1, 18, 72>}, {pipeline_mode = #tpu.pipeline_mode<synchronous>, transform_indices = @transform_1, window_bounds = array<i64: 9, 64>}, {pipeline_mode = #tpu.pipeline_mode<synchronous>, transform_indices = @transform_2, window_bounds = array<i64: 64, 128>}, {transform_indices = @transform_3, window_bounds = array<i64: 1, 8, 128>}]} {
    %c8_i32 = arith.constant 8 : i32
    %0 = arith.muli %arg1, %c8_i32 : i32
    %1 = tpu.assume_multiple %0, 8 : i32
    %c0 = arith.constant 0 : index
    %c0_0 = arith.constant 0 : index
    %2 = vector.load %arg3[%c0, %c0_0] : memref<9x64xf32, #tpu.memory_space<vmem>>, vector<9x64xf32>
    %c0_i32 = arith.constant 0 : i32
    %3 = arith.addi %1, %c0_i32 : i32
    %c0_1 = arith.constant 0 : index
    %4 = arith.index_cast %3 : i32 to index
    %c0_2 = arith.constant 0 : index
    %5 = vector.load %arg2[%c0_1, %4, %c0_2] : memref<1x18x72xf32, #tpu.memory_space<vmem>>, vector<1x8x72xf32>
    %6 = vector.shape_cast %5 : vector<1x8x72xf32> to vector<8x72xf32>
    %7 = vector.extract_strided_slice %6 {offsets = [0, 0], sizes = [8, 64], strides = [1, 1]} : vector<8x72xf32> to vector<8x64xf32>
    %8 = vector.extract_strided_slice %2 {offsets = [0, 0], sizes = [1, 64], strides = [1, 1]} : vector<9x64xf32> to vector<1x64xf32>
    %9 = vector.shape_cast %8 : vector<1x64xf32> to vector<64xf32>
    %10 = vector.shape_cast %9 : vector<64xf32> to vector<1x64xf32>
    %11 = vector.broadcast %10 : vector<1x64xf32> to vector<8x64xf32>
    %12 = arith.mulf %7, %11 : vector<8x64xf32>
    %13 = vector.extract_strided_slice %6 {offsets = [0, 4], sizes = [8, 64], strides = [1, 1]} : vector<8x72xf32> to vector<8x64xf32>
    %14 = vector.extract_strided_slice %2 {offsets = [1, 0], sizes = [1, 64], strides = [1, 1]} : vector<9x64xf32> to vector<1x64xf32>
    %15 = vector.shape_cast %14 : vector<1x64xf32> to vector<64xf32>
    %16 = vector.shape_cast %15 : vector<64xf32> to vector<1x64xf32>
    %17 = vector.broadcast %16 : vector<1x64xf32> to vector<8x64xf32>
    %18 = arith.mulf %13, %17 : vector<8x64xf32>
    %19 = arith.addf %12, %18 : vector<8x64xf32>
    %20 = vector.extract_strided_slice %6 {offsets = [0, 8], sizes = [8, 64], strides = [1, 1]} : vector<8x72xf32> to vector<8x64xf32>
    %21 = vector.extract_strided_slice %2 {offsets = [2, 0], sizes = [1, 64], strides = [1, 1]} : vector<9x64xf32> to vector<1x64xf32>
    %22 = vector.shape_cast %21 : vector<1x64xf32> to vector<64xf32>
    %23 = vector.shape_cast %22 : vector<64xf32> to vector<1x64xf32>
    %24 = vector.broadcast %23 : vector<1x64xf32> to vector<8x64xf32>
    %25 = arith.mulf %20, %24 : vector<8x64xf32>
    %26 = arith.addf %19, %25 : vector<8x64xf32>
    %c1_i32 = arith.constant 1 : i32
    %27 = arith.addi %1, %c1_i32 : i32
    %c0_3 = arith.constant 0 : index
    %28 = arith.index_cast %27 : i32 to index
    %c0_4 = arith.constant 0 : index
    %29 = vector.load %arg2[%c0_3, %28, %c0_4] : memref<1x18x72xf32, #tpu.memory_space<vmem>>, vector<1x8x72xf32>
    %30 = vector.shape_cast %29 : vector<1x8x72xf32> to vector<8x72xf32>
    %31 = vector.extract_strided_slice %30 {offsets = [0, 0], sizes = [8, 64], strides = [1, 1]} : vector<8x72xf32> to vector<8x64xf32>
    %32 = vector.extract_strided_slice %2 {offsets = [3, 0], sizes = [1, 64], strides = [1, 1]} : vector<9x64xf32> to vector<1x64xf32>
    %33 = vector.shape_cast %32 : vector<1x64xf32> to vector<64xf32>
    %34 = vector.shape_cast %33 : vector<64xf32> to vector<1x64xf32>
    %35 = vector.broadcast %34 : vector<1x64xf32> to vector<8x64xf32>
    %36 = arith.mulf %31, %35 : vector<8x64xf32>
    %37 = arith.addf %26, %36 : vector<8x64xf32>
    %38 = vector.extract_strided_slice %30 {offsets = [0, 4], sizes = [8, 64], strides = [1, 1]} : vector<8x72xf32> to vector<8x64xf32>
    %39 = vector.extract_strided_slice %2 {offsets = [4, 0], sizes = [1, 64], strides = [1, 1]} : vector<9x64xf32> to vector<1x64xf32>
    %40 = vector.shape_cast %39 : vector<1x64xf32> to vector<64xf32>
    %41 = vector.shape_cast %40 : vector<64xf32> to vector<1x64xf32>
    %42 = vector.broadcast %41 : vector<1x64xf32> to vector<8x64xf32>
    %43 = arith.mulf %38, %42 : vector<8x64xf32>
    %44 = arith.addf %37, %43 : vector<8x64xf32>
    %45 = vector.extract_strided_slice %30 {offsets = [0, 8], sizes = [8, 64], strides = [1, 1]} : vector<8x72xf32> to vector<8x64xf32>
    %46 = vector.extract_strided_slice %2 {offsets = [5, 0], sizes = [1, 64], strides = [1, 1]} : vector<9x64xf32> to vector<1x64xf32>
    %47 = vector.shape_cast %46 : vector<1x64xf32> to vector<64xf32>
    %48 = vector.shape_cast %47 : vector<64xf32> to vector<1x64xf32>
    %49 = vector.broadcast %48 : vector<1x64xf32> to vector<8x64xf32>
    %50 = arith.mulf %45, %49 : vector<8x64xf32>
    %51 = arith.addf %44, %50 : vector<8x64xf32>
    %c2_i32 = arith.constant 2 : i32
    %52 = arith.addi %1, %c2_i32 : i32
    %c0_5 = arith.constant 0 : index
    %53 = arith.index_cast %52 : i32 to index
    %c0_6 = arith.constant 0 : index
    %54 = vector.load %arg2[%c0_5, %53, %c0_6] : memref<1x18x72xf32, #tpu.memory_space<vmem>>, vector<1x8x72xf32>
    %55 = vector.shape_cast %54 : vector<1x8x72xf32> to vector<8x72xf32>
    %56 = vector.extract_strided_slice %55 {offsets = [0, 0], sizes = [8, 64], strides = [1, 1]} : vector<8x72xf32> to vector<8x64xf32>
    %57 = vector.extract_strided_slice %2 {offsets = [6, 0], sizes = [1, 64], strides = [1, 1]} : vector<9x64xf32> to vector<1x64xf32>
    %58 = vector.shape_cast %57 : vector<1x64xf32> to vector<64xf32>
    %59 = vector.shape_cast %58 : vector<64xf32> to vector<1x64xf32>
    %60 = vector.broadcast %59 : vector<1x64xf32> to vector<8x64xf32>
    %61 = arith.mulf %56, %60 : vector<8x64xf32>
    %62 = arith.addf %51, %61 : vector<8x64xf32>
    %63 = vector.extract_strided_slice %55 {offsets = [0, 4], sizes = [8, 64], strides = [1, 1]} : vector<8x72xf32> to vector<8x64xf32>
    %64 = vector.extract_strided_slice %2 {offsets = [7, 0], sizes = [1, 64], strides = [1, 1]} : vector<9x64xf32> to vector<1x64xf32>
    %65 = vector.shape_cast %64 : vector<1x64xf32> to vector<64xf32>
    %66 = vector.shape_cast %65 : vector<64xf32> to vector<1x64xf32>
    %67 = vector.broadcast %66 : vector<1x64xf32> to vector<8x64xf32>
    %68 = arith.mulf %63, %67 : vector<8x64xf32>
    %69 = arith.addf %62, %68 : vector<8x64xf32>
    %70 = vector.extract_strided_slice %55 {offsets = [0, 8], sizes = [8, 64], strides = [1, 1]} : vector<8x72xf32> to vector<8x64xf32>
    %71 = vector.extract_strided_slice %2 {offsets = [8, 0], sizes = [1, 64], strides = [1, 1]} : vector<9x64xf32> to vector<1x64xf32>
    %72 = vector.shape_cast %71 : vector<1x64xf32> to vector<64xf32>
    %73 = vector.shape_cast %72 : vector<64xf32> to vector<1x64xf32>
    %74 = vector.broadcast %73 : vector<1x64xf32> to vector<8x64xf32>
    %75 = arith.mulf %70, %74 : vector<8x64xf32>
    %76 = arith.addf %69, %75 : vector<8x64xf32>
    %c0_7 = arith.constant 0 : index
    %c0_8 = arith.constant 0 : index
    %77 = vector.load %arg4[%c0_7, %c0_8] : memref<64x128xf32, #tpu.memory_space<vmem>>, vector<64x128xf32>
    %cst = arith.constant dense<0.000000e+00> : vector<8x128xf32>
    %78 = tpu.matmul %76, %77, %cst {dimension_numbers = #tpu.dot_dimension_numbers<[1], [0], [0], [1], [0, 0, 1, 1], [], []>} : vector<8x64xf32>, vector<64x128xf32>, vector<8x128xf32> -> vector<8x128xf32>
    %c0_9 = arith.constant 0 : index
    %c0_10 = arith.constant 0 : index
    %c0_11 = arith.constant 0 : index
    %79 = vector.load %arg5[%c0_9, %c0_10, %c0_11] : memref<1x8x128xf32, #tpu.memory_space<vmem>>, vector<1x8x128xf32>
    %80 = vector.shape_cast %79 : vector<1x8x128xf32> to vector<8x128xf32>
    %81 = vector.shape_cast %78 : vector<8x128xf32> to vector<1x8x128xf32>
    tpu.vector_store %arg5[%c0_9, %c0_10, %c0_11], %81 {strides = array<i32>} : memref<1x8x128xf32, #tpu.memory_space<vmem>>, vector<1x8x128xf32>,
    return
  }
  func.func @transform_0(%arg0: i32, %arg1: i32) -> (i32, i32, i32) {
    %c0_i32 = arith.constant 0 : i32
    %c0_i32_0 = arith.constant 0 : i32
    %c0_i32_1 = arith.constant 0 : i32
    return %arg0, %c0_i32, %c0_i32_0 : i32, i32, i32
  }
  func.func @transform_1(%arg0: i32, %arg1: i32) -> (i32, i32) {
    %c0_i32 = arith.constant 0 : i32
    %c0_i32_0 = arith.constant 0 : i32
    %c0_i32_1 = arith.constant 0 : i32
    return %c0_i32, %c0_i32_0 : i32, i32
  }
  func.func @transform_2(%arg0: i32, %arg1: i32) -> (i32, i32) {
    %c0_i32 = arith.constant 0 : i32
    %c0_i32_0 = arith.constant 0 : i32
    %c0_i32_1 = arith.constant 0 : i32
    return %c0_i32, %c0_i32_0 : i32, i32
  }
  func.func @transform_3(%arg0: i32, %arg1: i32) -> (i32, i32, i32) {
    %c0_i32 = arith.constant 0 : i32
    %c0_i32_0 = arith.constant 0 : i32
    return %arg0, %arg1, %c0_i32 : i32, i32, i32
  }
}

</mosaic_0001>

<bundles_post_ra>
// kernel: separable_conv2d_nhwc.1
= control target key start
LH: loop header
LB: loop body
LE: loop exit
PB: predicated region body
PF: predicated region fallthrough
CT: control target
= control target key end

     0   :  { %s523_s12 = smov 0   ;;  %s525_s13 = smov 0   ;;  %s627_s0 = inlined_call_operand.vmem [shape: f32[2,18,72], index: 0, kind: input, shape index: {}]   ;;  %s628_s1 = inlined_call_operand.vmem [shape: f32[9,64], index: 1, kind: input, shape index: {}]   ;;  %s629_s2 = inlined_call_operand.vmem [shape: f32[64,128], index: 2, kind: input, shape index: {}]   ;;  %s630_s3 = inlined_call_operand.vmem [shape: f32[2,16,128], index: 3, kind: output, shape index: {}]  }
   0x1   :  { %s527_s14 = smov 0   ;;  %s529_s15 = smov 0  }
   0x2   :  { %s531_s16 = smov 0  }
   0x3 LB: > { %s22_s17 = sadd.s32 1, %s489_s14  ;;  %s25_s18 = sadd.s32 1, %s493_s15  ;;  %s497_s16 = sphi %s531_s16, %s13_s16   ;;  %s493_s15 = sphi %s529_s15, %s634_s15   ;;  %s489_s14 = sphi %s527_s14, %s633_s14   ;;  %s485_s13 = sphi %s525_s13, %s632_s13   ;;  %s481_s12 = sphi %s523_s12, %s631_s12  }
   0x4   : > { %p23_p0 = scmp.ge.s32.totalorder %s22_s17, 2  ;;  %p401_p1 = scmp.ge.s32.totalorder %s497_s16, 1 }
   0x5   : > { %p151_p2 = scmp.lt.s32.totalorder %s497_s16, 5 }
   0x6   : > { %s636_s17 = smov (%p23_p0, %s22_s17), 0  ;;  %s638_s18 = smov (!%p23_p0, %s25_s18), %s493_s15 }
   0x7   : > { %p152_p3 = pnand %p401_p1, %p151_p2  ;;  %p27_p4 = scmp.ge.s32.totalorder %s638_s18, 2 }
   0x8   : > { %s499_s21 = smov (!%p152_p3), 4   ;;  %s500_s24 = smov (!%p152_p3), 8  }
   0x9   : > { %s640_s18 = smov (%p27_p4, %s638_s18), 0  ;;  %155 = sbr.rel (%p152_p3) target bundleno = 398 (0x18e), region = 32 }
   0xa   : > { %p178_p5 = scmp.lt.s32.totalorder (!%p152_p3), %s485_s13, 1  ;;  %s405_s29 = sshll.u32 (!%p152_p3), %s481_s12, 3 }
   0xb   : > { %s501_s4 = smov (!%p152_p3), 124   ;;  %s502_s5 = smov (!%p152_p3), 120  }
   0xc   : > { %p185_p6 = scmp.lt.s32.totalorder (!%p152_p3), %s481_s12, 1 }
   0xe   : > { %v560_v0 = vld [vmem:[%s628_s1] sm:$0xff]  ;;  %v458_v6 = vld [vmem:[%s628_s1 + $0x8] ss:$0 sm:$0xff]  ;;  %s642_s13 = smov (!%p178_p5, %s485_s13), 1  ;;  %v283_v22 = vld [vmem:[%s629_s2 + $0x38] sm:$0xff]  ;;  %vm284_vm0 = vcmask 523264  }
   0xf   : > { %v198_v1 = vperm.slane %v560_v0, 1  ;;  %v226_v2 = vperm.slane %v560_v0, 4  ;;  %v254_v3 = vperm.slane %v560_v0, 7  ;;  %v209_v4 = vperm.slane %v560_v0, 2  ;;  %s413_s25 = smul.u32 24, %s642_s13  ;;  %296 = vmatpush.msra.mxu0 %v283_v22  ;;  %v282_v23 = vld [vmem:[%s629_s2 + $0x30] sm:$0xff] }
  0x10   : > { %v237_v5 = vperm.slane %v560_v0, 5  ;;  %v281_v24 = vld [vmem:[%s629_s2 + $0x28] sm:$0xff]  ;;  %v280_v25 = vld [vmem:[%s629_s2 + $0x20] sm:$0xff]  ;;  %v279_v26 = vld [vmem:[%s629_s2 + $0x18] sm:$0xff]  ;;  %v196_v30 = vperm.slane %v560_v0, 0  ;;  %v223_v32 = vperm.slane %v560_v0, 3 }
  0x11   : > { %200 = vrot.lane.b32.xlu0 %v198_v1, %s499_s21  ;;  %228 = vrot.lane.b32.xlu1 %v226_v2, %s499_s21  ;;  %s182_s28 = scalar_lea.vmem %s627_s0, %s413_s25  ;;  %v278_v27 = vld [vmem:[%s629_s2 + $0x10] sm:$0xff]  ;;  %v277_v28 = vld [vmem:[%s629_s2 + $0x8] sm:$0xff]  ;;  %v251_v38 = vperm.slane %v560_v0, 6  ;;  %s644_s12 = smov (!%p185_p6, %s481_s12), 1 }
  0x12   : > { %256 = vrot.lane.b32.xlu2 %v254_v3, %s499_s21  ;;  %s194_s30 = scalar_lea.vmem %s182_s28, %s405_s29  ;;  %297 = vmatpush.msra.mxu0 %v282_v23  ;;  %v276_v29 = vld [vmem:[%s629_s2] sm:$0xff]  ;;  %s403_s29 = sshll.u32 %s642_s13, 1 }
  0x13   : > { %v195_v8 = vld [vmem:[%s194_s30] sm:$0xff] }
  0x14   : > { %v407_v9 = vld [vmem:[%s194_s30 + $0x1] sm:$0xff]  ;;  %298 = vmatpush.msra.mxu0 %v281_v24  ;;  %v197_v31 = vmul.f32 %v196_v30, %v195_v8 }
  0x15   : > { %v409_v15 = vld [vmem:[%s194_s30 + $0x2] sm:$0xff]  ;;  %v224_v35 = vmul.f32 %v407_v9, %v223_v32  ;;  %s188_s30 = sadd.s32 %s403_s29, %s644_s12 }
  0x16   : > { %299 = vmatpush.msra.mxu0 %v280_v25  ;;  %v252_v43 = vmul.f32 %v409_v15, %v251_v38 }
  0x18   : > { %300 = vmatpush.msra.mxu0 %v279_v26 }
  0x19   : > { %211 = vrot.lane.b32.xlu0 %v209_v4, %s500_s24  ;;  %239 = vrot.lane.b32.xlu1 %v237_v5, %s500_s24 }
  0x1a   : > { %267 = vrot.lane.b32.xlu2 %v458_v6, %s500_s24  ;;  %301 = vmatpush.msra.mxu0 %v278_v27 }
  0x1c   : > { %302 = vmatpush.msra.mxu0 %v277_v28 }
  0x1e   : > { %303 = vmatpush.msra.mxu0 %v276_v29 }
  0x6c   : > { %v257_v7 = vpop.permute.xlu2 %256 }
  0x6d   : > { %v259_v21 = vmul.f32 %v409_v15, %v257_v7 }
  0x74   : > { %v268_v14 = vpop.permute.xlu2 %267 }
  0x75   : > { %v270_v18 = vmul.f32 %v409_v15, %v268_v14 }
  0x83   : > { %v201_v10 = vpop.permute.xlu0 %200  ;;  %v229_v11 = vpop.permute.xlu1 %228 }
  0x84   : > { %v203_v12 = vmul.f32 %v201_v10, %v195_v8  ;;  %v231_v13 = vmul.f32 %v407_v9, %v229_v11 }
  0x86   : > { %205 = vrot.lane.b32.xlu0 %v203_v12, %s501_s4  ;;  %233 = vrot.lane.b32.xlu2 %v231_v13, %s501_s4 }
  0x8b   : > { %v212_v16 = vpop.permute.xlu0 %211  ;;  %v240_v17 = vpop.permute.xlu1 %239 }
  0x8c   : > { %v214_v19 = vmul.f32 %v212_v16, %v195_v8  ;;  %v242_v20 = vmul.f32 %v407_v9, %v240_v17 }
  0x8e   : > { %216 = vrot.lane.b32.xlu1 %v214_v19, %s502_s5  ;;  %244 = vrot.lane.b32.xlu0 %v242_v20, %s502_s5 }
  0x8f   : > { %272 = vrot.lane.b32.xlu2 %v270_v18, %s502_s5 }
  0x96   : > { %261 = vrot.lane.b32.xlu1 %v259_v21, %s501_s4  ;;  %s404_s4 = sshll.u32 %s188_s30, 3 }
  0x97   : > { %s190_s7 = scalar_lea.vmem %s630_s3, %s404_s4 }
  0xe0   : > { %v234_v39 = vpop.permute.xlu2 %233 }
  0xe9   : > { %v273_v47 = vpop.permute.xlu2 %272 }
  0xf8   : > { %v206_v33 = vpop.permute.xlu0 %205 }
  0xf9   : > { %v208_v34 = vadd.f32 %v206_v33, %v197_v31 }
 0x100   : > { %v217_v36 = vpop.permute.xlu1 %216  ;;  %v245_v41 = vpop.permute.xlu0 %244 }
 0x101   : > { %v219_v37 = vadd.f32 %v217_v36, %v208_v34 }
 0x103   : > { %v225_v40 = vadd.f32 %v224_v35, %v219_v37 }
 0x105   : > { %v236_v42 = vadd.f32 %v234_v39, %v225_v40 }
 0x107   : > { %v247_v44 = vadd.f32 %v245_v41, %v236_v42 }
 0x108   : > { %v262_v45 = vpop.permute.xlu1 %261 }
 0x109   : > { %v253_v46 = vadd.f32 %v252_v43, %v247_v44 }
 0x10b   : > { %v264_v48 = vadd.f32 %v262_v45, %v253_v46 }
 0x10d   : > { %v275_v49 = vadd.f32 %v273_v47, %v264_v48 }
 0x10f   : > { %410 = vmatmul.msk.f32.vlgmr.msra.gmra.mxu0 %vm284_vm0, %v275_v49 }
 0x18c   : > { %v305_v50 = vpop.f32.mrf.mxu0 }
 0x18d   : > { %308 = vst [vmem:[%s190_s7] sm:$0xff] %v305_v50 }
 0x18e PF: > { %s13_s16 = sadd.s32 1, %s497_s16   ;;  %s631_s12 = smov %s489_s14 }
 0x18f   : > { %p10_p7 = scmp.ge.s32.totalorder %s13_s16, 6   ;;  %s632_s13 = smov %s493_s15 }
 0x190   : > { %s633_s14 = smov %s636_s17  ;;  %s634_s15 = smov %s640_s18 }
 0x191   :  { %12 = sbr.rel (!%p10_p7) target bundleno = 3 (0x3), region = 65 }

</bundles_post_ra>
